<compile_context>
chip_gen: v7x
topology: tpu7x:2x2x1
jax: 0.10.0
libtpu: 0.0.40
codegen_flags: <defaults>
</compile_context>

<pallas_src>
import math

import jax
import jax.numpy as jnp
from jax.experimental import pallas as pl
from jax.experimental.pallas import tpu as pltpu


def make_pos_enc(d_model: int, max_seq_len: int = 128) -> jnp.ndarray:
    """Deterministic sinusoidal positional-encoding table, shape (max_seq_len, d_model)."""
    pos = jnp.arange(max_seq_len, dtype=jnp.float32)[:, None]             # (L, 1)
    div_term = jnp.exp(
        jnp.arange(0, d_model, 2, dtype=jnp.float32) * (-math.log(10000.0) / d_model)
    )                                                                      # (D/2,)
    angles = pos * div_term                                                # (L, D/2)
    pe = jnp.zeros((max_seq_len, d_model), dtype=jnp.float32)
    pe = pe.at[:, 0::2].set(jnp.sin(angles))
    pe = pe.at[:, 1::2].set(jnp.cos(angles))
    return pe


def _pos_enc_add_kernel(x_ref, pe_ref, o_ref):
    # x_ref / o_ref: (tile_rows, tile_lanes) block of the fused (B, S*D) view.
    # pe_ref: (1, tile_lanes) float32 row, block index constant along rows ->
    # resident in VMEM; the add sublane-broadcasts it (plain VPU work, DMA-bound).
    o_ref[...] = (x_ref[...] + pe_ref[...]).astype(o_ref.dtype)


def _vmem_limit_bytes() -> int:
    """Explicit scoped-VMEM limit: physical capacity with ~25% headroom."""
    try:
        cap = int(pltpu.get_tpu_info().vmem_capacity_bytes)
    except Exception:
        cap = 64 << 20  # v7x per-TC worst case; safe everywhere
    return (cap * 3) // 4


def _num_tensorcores() -> int:
    """2 on megacore / multi-TC chips (v4, v5p, v7x); 1 on v5e / v6e."""
    try:
        kind = jax.devices()[0].device_kind.lower()
        if ("v7" in kind) or ("v4" in kind) or ("v5p" in kind):
            return 2
    except Exception:
        pass
    return 1


def _choose_tiles(n_rows: int, n_lanes: int, itemsize: int,
                  vmem_limit: int, num_cores: int):
    """Pick (tile_rows, tile_lanes) for the fused (B, S*D) view.

    Budget accounting: 2 x-buffers + 2 out-buffers + resident PE (+ headroom)
    -> each streamed block gets ~1/5 of the VMEM limit, capped at the measured
    16 MiB HBM-roofline sweet spot.
    """
    pack = max(8, 32 // itemsize)                       # 8 f32, 16 bf16, 32 int8
    block_budget = max(1 << 20, min(16 << 20, vmem_limit // 5))
    row_bytes = n_lanes * itemsize

    if pack * row_bytes <= block_budget or n_lanes <= 128:
        # Whole fused rows fit -> tile along rows only (full-L lane-dense stores).
        tile_lanes = n_lanes
        max_rows = max(pack, (block_budget // max(row_bytes, 1)) // pack * pack)
        if n_rows <= max_rows:
            if (num_cores >= 2 and n_rows >= 2 * pack
                    and n_rows * row_bytes >= (2 << 20)):
                # Two comparable row tiles so both TensorCores stream HBM.
                tile_rows = pl.cdiv(pl.cdiv(n_rows, 2), pack) * pack
            else:
                tile_rows = n_rows          # single block; full extent is legal
        else:
            tile_rows = max_rows            # multiple of pack, fits budget
    else:
        # A single fused row exceeds the budget: also tile the lane dimension
        # (multiples of 128) so blocks stay bounded on any generation.
        tile_rows = pack if n_rows >= pack else n_rows
        max_lanes = max(128, (block_budget // (tile_rows * itemsize)) // 128 * 128)
        tile_lanes = min(max_lanes, max(128, (n_lanes // 128) * 128))
    return tile_rows, tile_lanes


def positional_encoding_forward(x: jnp.ndarray, pos_enc: jnp.ndarray, *,
                                donate_x: bool = False,
                                force_pallas: bool = False,
                                min_pallas_bytes: int = 1 << 20) -> jnp.ndarray:
    """x: (B, S, D); pos_enc: (max_seq_len, D). Returns x + pos_enc[:S]."""
    B, S, D = x.shape
    L = S * D
    itemsize = jnp.dtype(x.dtype).itemsize

    # Tiny-shape fast path: fixed custom-call + pipeline cost dominates, and XLA
    # can fuse the add into neighbouring ops (no extra HBM round trip).
    if not force_pallas and B * L * itemsize < min_pallas_bytes:
        return (x + pos_enc[None, :S, :]).astype(x.dtype)

    # Lane-dense fuse: (B, S, D) -> (B, S*D); PE kept in float32 (PyTorch buffer
    # is fp32); only the sum is cast to the activation dtype inside the kernel.
    x2 = x.reshape(B, L)
    pe2 = pos_enc[:S, :].astype(jnp.float32).reshape(1, L)

    vmem_limit = _vmem_limit_bytes()
    tile_rows, tile_lanes = _choose_tiles(B, L, itemsize, vmem_limit,
                                          _num_tensorcores())
    grid_rows = pl.cdiv(B, tile_rows)
    grid_lanes = pl.cdiv(L, tile_lanes)

    if grid_lanes == 1:
        grid = (grid_rows,)
        x_spec = pl.BlockSpec((tile_rows, L), lambda i: (i, 0))
        pe_spec = pl.BlockSpec((1, L), lambda i: (0, 0))
        o_spec = pl.BlockSpec((tile_rows, L), lambda i: (i, 0))
        dims = ("parallel",)
    else:
        grid = (grid_rows, grid_lanes)
        x_spec = pl.BlockSpec((tile_rows, tile_lanes), lambda i, j: (i, j))
        pe_spec = pl.BlockSpec((1, tile_lanes), lambda i, j: (0, j))
        o_spec = pl.BlockSpec((tile_rows, tile_lanes), lambda i, j: (i, j))
        dims = ("parallel", "parallel")

    extra_kwargs = {}
    if donate_x:
        # Only alias when the caller actually donates x; otherwise XLA inserts a
        # defensive full copy that costs more than the kernel on this mem-bound op.
        extra_kwargs["input_output_aliases"] = {0: 0}

    out2 = pl.pallas_call(
        _pos_enc_add_kernel,
        out_shape=jax.ShapeDtypeStruct((B, L), x.dtype),
        grid_spec=pltpu.PrefetchScalarGridSpec(
            num_scalar_prefetch=0,
            grid=grid,
            in_specs=[x_spec, pe_spec],
            out_specs=o_spec,
        ),
        compiler_params=pltpu.CompilerParams(
            dimension_semantics=dims,
            vmem_limit_bytes=vmem_limit,
        ),
        cost_estimate=pl.CostEstimate(
            flops=B * L,
            transcendentals=0,
            bytes_accessed=2 * B * L * itemsize + L * 4,
        ),
        **extra_kwargs,
    )(x2, pe2)

    return out2.reshape(B, S, D)


if __name__ == "__main__":
    # Small shapes consistent with the module's forward: (batch, seq, d_model)
    B, S, D = 2, 8, 32
    MAX_SEQ_LEN = 128

    key = jax.random.PRNGKey(0)
    x = jax.random.normal(key, (B, S, D), dtype=jnp.float32)

    pos_enc = make_pos_enc(D, MAX_SEQ_LEN)

    # Pure-JAX reference.
    ref = x + pos_enc[None, :S, :]

    # Force the Pallas path so the kernel itself is exercised at this tiny shape
    # (the default wrapper takes the pure-JAX fast path below ~1 MiB).
    out = positional_encoding_forward(x, pos_enc, force_pallas=True)
    out = jax.block_until_ready(out)

    assert out.shape == (B, S, D)
    assert jnp.allclose(out, ref, atol=1e-6), "mismatch vs reference (pallas path)"

    # Also sanity-check the default wrapper (tiny-shape fast path).
    out_fast = jax.block_until_ready(positional_encoding_forward(x, pos_enc))
    assert jnp.allclose(out_fast, ref, atol=1e-6), "mismatch vs reference (fast path)"

    print("KERNEL_OK")
</pallas_src>

<mosaic_0001>
module attributes {stable_mosaic.version = 11 : i64} {
  func.func @_pos_enc_add_kernel(%arg0: i32, %arg1: memref<2x256xf32, #tpu.memory_space<vmem>>, %arg2: memref<1x256xf32, #tpu.memory_space<vmem>>, %arg3: memref<2x256xf32, #tpu.memory_space<vmem>>) attributes {dimension_semantics = [#tpu.dimension_semantics<parallel>], iteration_bounds = array<i64: 1>, scalar_prefetch = 0 : i64, scratch_operands = 0 : i64, tpu.core_type = #tpu.core_type<tc>, window_params = [{transform_indices = @transform_0, window_bounds = array<i64: 2, 256>}, {pipeline_mode = #tpu.pipeline_mode<synchronous>, transform_indices = @transform_1, window_bounds = array<i64: 1, 256>}, {transform_indices = @transform_2, window_bounds = array<i64: 2, 256>}]} {
    %c0 = arith.constant 0 : index
    %c0_0 = arith.constant 0 : index
    %0 = vector.load %arg1[%c0, %c0_0] : memref<2x256xf32, #tpu.memory_space<vmem>>, vector<2x256xf32>
    %c0_1 = arith.constant 0 : index
    %c0_2 = arith.constant 0 : index
    %1 = vector.load %arg2[%c0_1, %c0_2] : memref<1x256xf32, #tpu.memory_space<vmem>>, vector<1x256xf32>
    %2 = vector.broadcast %1 : vector<1x256xf32> to vector<2x256xf32>
    %3 = arith.addf %0, %2 : vector<2x256xf32>
    %c0_3 = arith.constant 0 : index
    %c0_4 = arith.constant 0 : index
    %4 = vector.load %arg3[%c0_3, %c0_4] : memref<2x256xf32, #tpu.memory_space<vmem>>, vector<2x256xf32>
    tpu.vector_store %arg3[%c0_3, %c0_4], %3 {strides = array<i32>} : memref<2x256xf32, #tpu.memory_space<vmem>>, vector<2x256xf32>,
    return
  }
  func.func @transform_0(%arg0: i32) -> (i32, i32) {
    %c0_i32 = arith.constant 0 : i32
    %c0_i32_0 = arith.constant 0 : i32
    return %arg0, %c0_i32 : i32, i32
  }
  func.func @transform_1(%arg0: i32) -> (i32, i32) {
    %c0_i32 = arith.constant 0 : i32
    %c0_i32_0 = arith.constant 0 : i32
    %c0_i32_1 = arith.constant 0 : i32
    return %c0_i32, %c0_i32_0 : i32, i32
  }
  func.func @transform_2(%arg0: i32) -> (i32, i32) {
    %c0_i32 = arith.constant 0 : i32
    %c0_i32_0 = arith.constant 0 : i32
    return %arg0, %c0_i32 : i32, i32
  }
}

</mosaic_0001>

<bundles_post_ra>
// kernel: tpu_custom_call.1
= control target key start
LH: loop header
LB: loop body
LE: loop exit
PB: predicated region body
PF: predicated region fallthrough
CT: control target
= control target key end

     0   :  { %7 = vsyncpa [#allocation3], 0  ;;  %s157_s0 = inlined_call_operand.hbm [shape: f32[2,256], index: 0, kind: input, shape index: {}]   ;;  %s158_s1 = inlined_call_operand.vmem [shape: f32[1,256], index: 1, kind: input, shape index: {}]   ;;  %s159_s2 = inlined_call_operand.hbm [shape: f32[2,256], index: 2, kind: output, shape index: {}]  }
   0x1   :  { %8 = vsyncpa [#allocation4], 0  ;;  %s112_s9 = smov [#allocation2]   ;;  %s64_s13 = scalar_lea.hbm %s157_s0, 64 }
   0x2   :  { %s15_s10 = sshll.u32 %s112_s9, 4  ;;  %p65_p0 = scmp.ne.s32.totalorder %s157_s0, %s64_s13  ;;  %s16_s10 = int_to_ptr.vmem [resolvable:$true] %s15_s10 }
   0x3   :  { %p68_p1 = scmp.lt.u32.totalorder %s64_s13, %s157_s0 }
   0x5   :  { %p70_p2 = pnand %p68_p1, %p65_p0 }
   0x7   :  { %73 = shalt.err (!%p70_p2)
}
   0x8   :  { %s74_s18 = scalar_lea.vmem %s16_s10, 64  ;;  %p79_p4 = scmp.lt.s32.totalorder %s16_s10, %s16_s10 }
   0x9   :  { %p75_p3 = scmp.ne.s32.totalorder %s16_s10, %s74_s18  ;;  %p80_p5 = scmp.lt.s32.totalorder %s74_s18, %s74_s18 }
   0xb   :  { %p81_p6 = por %p80_p5, %p79_p4 }
   0xd   :  { %p82_p7 = pnand %p81_p6, %p75_p3 }
   0xf   :  { %85 = shalt.err (!%p82_p7)
}
  0x10   :  { %18 = dma.hbm_to_vmem [thread:$0]  %s157_s0, 64, %s16_s10, [#allocation3]  }
  0x11   :  { %108 = dma.done.wait [#allocation3], 64  }
  0x12   :  { %109 = vsyncadd [#allocation3], 4294967232  ;;  %v27_v0 = vlaneseq  ;;  %v113_v1 = vmov 1983009808   ;;  %v25_v7 = vld [vmem:[%s158_s1] sm:$0x3] }
  0x13   :  { %v37_v2 = vunpack.c.l.s4 %v113_v1  ;;  %v24_v12 = vld [vmem:[#allocation2] sm:$0xf]  ;;  %s114_s23 = smov [#allocation5]  }
  0x14   :  { %v28_v3 = vshrl.u32 %v27_v0, 7  ;;  %s52_s0 = sshll.u32 %s114_s23, 4  ;;  %s53_s0 = int_to_ptr.vmem [resolvable:$true] %s52_s0 }
  0x15   :  { %v38_v6 = vunpack.c.0.s8 %v37_v2  ;;  %s86_s24 = scalar_lea.vmem %s53_s0, 64  ;;  %p91_p9 = scmp.lt.s32.totalorder %s53_s0, %s53_s0 }
  0x16   :  { %v29_v4 = vsub.s32 0, %v28_v3  ;;  %v33_v5 = vsub.s32 1, %v28_v3  ;;  %p87_p8 = scmp.ne.s32.totalorder %s53_s0, %s86_s24  ;;  %p92_p10 = scmp.lt.s32.totalorder %s86_s24, %s86_s24 }
  0x17   :  { %v41_v10 = vsub.s32 %v38_v6, %v28_v3 }
  0x18   :  { %v30_v8 = vrot.slane %v25_v7, %v29_v4  ;;  %v34_v9 = vrot.slane %v25_v7, %v33_v5  ;;  %p93_p11 = por %p92_p10, %p91_p9 }
  0x1a   :  { %v35_v11 = vcombine.low %v30_v8, %v34_v9  ;;  %p94_p12 = pnand %p93_p11, %p87_p8 }
  0x1c   :  { %v42_v13 = vrot.slane %v35_v11, %v41_v10 }
  0x1e   :  { %v44_v14 = vadd.f32 %v42_v13, %v24_v12 }
  0x20   :  { %45 = vst [vmem:[#allocation5] sm:$0xf] %v44_v14 }
  0x21   :  { %97 = shalt.err (!%p94_p12)
}
  0x22   :  { %s98_s26 = scalar_lea.hbm %s159_s2, 64 }
  0x23   :  { %p99_p13 = scmp.ne.s32.totalorder %s159_s2, %s98_s26  ;;  %p102_p0 = scmp.lt.u32.totalorder %s98_s26, %s159_s2 }
  0x25   :  { %p104_p1 = pnand %p102_p0, %p99_p13 }
  0x27   :  { %107 = shalt.err (!%p104_p1)
}
  0x28   :  { %55 = dma.vmem_to_hbm [thread:$0]  %s53_s0, 64, %s159_s2, [#allocation4]  }
  0x29   :  { %110 = dma.done.wait [#allocation4], 64  }
  0x2a   :  { %111 = vsyncadd [#allocation4], 4294967232 }
  0x2b   :  { %59 = vsyncpa [#allocation3], 1 }
  0x2c   :  { %60 = vsyncpa [#allocation4], 1 }

</bundles_post_ra>
